<compile_context>
chip_gen: v7x
topology: tpu7x:2x2x1
jax: 0.10.0
libtpu: 0.0.40
codegen_flags: <defaults>
</compile_context>

<pallas_src>
import jax
import jax.numpy as jnp
from jax import lax
from jax.experimental import pallas as pl
from jax.experimental.pallas import tpu as pltpu


def _round_up(x, m):
    return pl.cdiv(x, m) * m


def _gmm_mapper_kernel(f_ref, a_ref, b_ref, mu_ref,
                       q_ref, logp_ref, assign_ref):
    f = f_ref[...]           # (1, TN)  f32
    a = a_ref[...]           # (Kp, 1)  f32 : log(w_k) - 0.5*log(2*pi*var_k)
    b = b_ref[...]           # (Kp, 1)  f32 : -0.5 / var_k
    mu = mu_ref[...]         # (Kp, 1)  f32

    # component densities: w_k * N(f_n; mu_k, var_k) = exp(a_k + b_k*(f-mu_k)^2)
    diff = f - mu                                   # (Kp, TN)
    comp = jnp.exp(a + b * diff * diff)             # (Kp, TN)

    # mixture pdf (sublane reduction over K) and per-point log-likelihood
    pdf = jnp.sum(comp, axis=0, keepdims=True)      # (1, TN)
    logp_ref[...] = jnp.log(pdf)

    # responsibilities Q: one reciprocal per point + multiply.
    # pdf == 0 (all comp == 0) is the only NaN source of comp/pdf; guard it on
    # the (1, TN) pdf -> q = 0 -> clamp to 1e-12, matching NaN->1e-12->clamp.
    inv_pdf = pl.reciprocal(jnp.maximum(pdf, 1e-38))
    q = jnp.clip(comp * inv_pdf, 1e-12, 1.0 - 1e-12)
    q_ref[...] = q

    # _row_mode: per-point top-2 over K (sublane axis), lowest-index tie-break
    kp = q.shape[0]
    idx = lax.broadcasted_iota(jnp.int32, q.shape, 0)           # (Kp, TN)

    top1_val = jnp.max(q, axis=0, keepdims=True)                # (1, TN)
    top1_idx = jnp.min(jnp.where(q == top1_val, idx, kp),
                       axis=0, keepdims=True)                   # (1, TN)

    masked = jnp.where(idx == top1_idx, -jnp.inf, q)            # drop top-1
    top2_val = jnp.max(masked, axis=0, keepdims=True)           # (1, TN)
    top2_idx = jnp.min(jnp.where(masked == top2_val, idx, kp),
                       axis=0, keepdims=True)                   # (1, TN)

    onehot1 = (idx == top1_idx).astype(q.dtype)
    onehot2 = (idx == top2_idx).astype(q.dtype)
    dominant = 0.5 * top1_val > top2_val                        # (1, TN) bool
    assign_ref[...] = jnp.where(dominant, 2.0 * onehot1, onehot1 + onehot2)


def opt_gmm_mapper_forward(f, free_para, means, var_para, *, tile_n=1024):
    """JAX/Pallas version of Opt_GMM_Mapper.forward numeric core.

    Args:
      f:         (N,) float32 filtration values (the 1-D lens function).
      free_para: (K,) float32 unnormalized mixture-weight logits.
      means:     (K,) float32 component means.
      var_para:  (K,) float32 log(sqrt(covariance)) per component.

    Returns:
      Q:                (N, K) responsibilities (forward's return value).
      log_likelihood:   (N,)   per-point log mixture density.
      mode_assignments: (N, K) _row_mode output.
    """
    K = free_para.shape[0]
    N = f.shape[0]

    # parameter glue (matches the PyTorch forward preamble)
    w = jnp.exp(free_para)
    w = w / jnp.sum(w)
    w = jnp.where(jnp.isnan(w), 1.0 / K, w)
    var = jnp.exp(var_para) ** 2

    # fold per-component constants so the kernel does exp(a + b*diff^2) only
    a = jnp.log(w) - 0.5 * jnp.log(2.0 * jnp.pi * var)
    b = -0.5 / var

    # pad K to a sublane multiple (padded components: comp == 0 exactly) and
    # N to a lane-dense tile multiple (padded points are sliced off after).
    K_pad = int(_round_up(K, 8))
    TILE_N = int(min(tile_n, _round_up(N, 128)))
    N_pad = int(_round_up(N, TILE_N))

    f2 = jnp.pad(f.astype(jnp.float32), (0, N_pad - N)).reshape(1, N_pad)
    a2 = jnp.pad(a.astype(jnp.float32), (0, K_pad - K),
                 constant_values=-1e30).reshape(K_pad, 1)
    b2 = jnp.pad(b.astype(jnp.float32), (0, K_pad - K)).reshape(K_pad, 1)
    mu2 = jnp.pad(means.astype(jnp.float32), (0, K_pad - K)).reshape(K_pad, 1)

    grid = (N_pad // TILE_N,)

    q_t, logp_row, assign_t = pl.pallas_call(
        _gmm_mapper_kernel,
        out_shape=(
            jax.ShapeDtypeStruct((K_pad, N_pad), jnp.float32),
            jax.ShapeDtypeStruct((1, N_pad), jnp.float32),
            jax.ShapeDtypeStruct((K_pad, N_pad), jnp.float32),
        ),
        grid=grid,
        in_specs=[
            pl.BlockSpec((1, TILE_N), lambda i: (0, i)),
            pl.BlockSpec((K_pad, 1), lambda i: (0, 0)),   # resident params
            pl.BlockSpec((K_pad, 1), lambda i: (0, 0)),
            pl.BlockSpec((K_pad, 1), lambda i: (0, 0)),
        ],
        out_specs=(
            pl.BlockSpec((K_pad, TILE_N), lambda i: (0, i)),
            pl.BlockSpec((1, TILE_N), lambda i: (0, i)),
            pl.BlockSpec((K_pad, TILE_N), lambda i: (0, i)),
        ),
        compiler_params=pltpu.CompilerParams(
            dimension_semantics=("parallel",)),
    )(f2, a2, b2, mu2)

    Q = q_t[:K, :N].T                  # (N, K) — same interface as PyTorch
    logp = logp_row[0, :N]             # (N,)
    assign = assign_t[:K, :N].T        # (N, K)
    return Q, logp, assign


def _reference(f, free_para, means, var_para):
    """Pure-JAX reference for correctness checking (mirrors the PyTorch math)."""
    K = free_para.shape[0]
    w = jnp.exp(free_para)
    w = w / jnp.sum(w)
    w = jnp.where(jnp.isnan(w), 1.0 / K, w)
    var = jnp.exp(var_para) ** 2
    diff = f[:, None] - means[None, :]
    comp = w[None, :] * jnp.exp(-0.5 * diff * diff / var[None, :]) \
           / jnp.sqrt(2.0 * jnp.pi * var[None, :])
    pdf = comp.sum(axis=1, keepdims=True)
    q = jnp.clip(jnp.nan_to_num(comp / pdf, nan=1e-12), 1e-12, 1 - 1e-12)
    return q, jnp.log(pdf[:, 0])


def _row_mode_reference(Q):
    """Pure-JAX top-2 row mode with lowest-index tie-breaking."""
    N, K = Q.shape
    idx = jnp.arange(K)
    top1_idx = jnp.argmax(Q, axis=1)
    top1_val = jnp.max(Q, axis=1)
    masked = jnp.where(idx[None, :] == top1_idx[:, None], -jnp.inf, Q)
    top2_idx = jnp.argmax(masked, axis=1)
    top2_val = jnp.max(masked, axis=1)
    onehot1 = (idx[None, :] == top1_idx[:, None]).astype(Q.dtype)
    onehot2 = (idx[None, :] == top2_idx[:, None]).astype(Q.dtype)
    dom = (0.5 * top1_val > top2_val)[:, None]
    return jnp.where(dom, 2.0 * onehot1, onehot1 + onehot2)


def _run_case(key, N, K, tile_n):
    k_f, k_means = jax.random.split(key)
    f = jax.random.normal(k_f, (N,), dtype=jnp.float32) * 2.0
    free_para = jnp.ones((K,), jnp.float32) / K          # weights init
    means = jax.random.normal(k_means, (K,), jnp.float32)
    var_para = jnp.zeros((K,), jnp.float32)              # log(sqrt(1.0)) = 0

    Q, logp, assign = opt_gmm_mapper_forward(f, free_para, means, var_para,
                                             tile_n=tile_n)
    jax.block_until_ready((Q, logp, assign))

    Q_ref, logp_ref = _reference(f, free_para, means, var_para)
    assert Q.shape == (N, K) and logp.shape == (N,) and assign.shape == (N, K)
    assert jnp.allclose(Q, Q_ref, atol=1e-5, rtol=1e-5)
    assert jnp.allclose(logp, logp_ref, atol=1e-5, rtol=1e-5)

    # each row of mode_assignments sums to exactly 2 (either 2 or 1+1)
    assert jnp.all(assign.sum(axis=1) == 2.0)
    # no all-zero rows (the assert in the PyTorch forward)
    assert bool(jnp.all(assign.sum(axis=1) > 0))
    # top-2 logic matches the reference row mode applied to the kernel's Q
    assert jnp.array_equal(assign, _row_mode_reference(Q))


if __name__ == "__main__":
    key = jax.random.PRNGKey(0)
    k1, k2 = jax.random.split(key)

    # case 1: mirrors the module defaults (single tile)
    _run_case(k1, N=256, K=8, tile_n=1024)
    # case 2: multi-block grid over N + K padded up to the sublane multiple
    _run_case(k2, N=1000, K=5, tile_n=512)

    print("KERNEL_OK")
</pallas_src>

<mosaic_0001>
module attributes {stable_mosaic.version = 11 : i64} {
  func.func @_gmm_mapper_kernel(%arg0: i32, %arg1: memref<1x256xf32, #tpu.memory_space<vmem>>, %arg2: memref<8x1xf32, #tpu.memory_space<vmem>>, %arg3: memref<8x1xf32, #tpu.memory_space<vmem>>, %arg4: memref<8x1xf32, #tpu.memory_space<vmem>>, %arg5: memref<8x256xf32, #tpu.memory_space<vmem>>, %arg6: memref<1x256xf32, #tpu.memory_space<vmem>>, %arg7: memref<8x256xf32, #tpu.memory_space<vmem>>) attributes {dimension_semantics = [#tpu.dimension_semantics<parallel>], iteration_bounds = array<i64: 1>, scalar_prefetch = 0 : i64, scratch_operands = 0 : i64, tpu.core_type = #tpu.core_type<tc>, window_params = [{transform_indices = @transform_0, window_bounds = array<i64: 1, 256>}, {pipeline_mode = #tpu.pipeline_mode<synchronous>, transform_indices = @transform_1, window_bounds = array<i64: 8, 1>}, {pipeline_mode = #tpu.pipeline_mode<synchronous>, transform_indices = @transform_2, window_bounds = array<i64: 8, 1>}, {pipeline_mode = #tpu.pipeline_mode<synchronous>, transform_indices = @transform_3, window_bounds = array<i64: 8, 1>}, {transform_indices = @transform_4, window_bounds = array<i64: 8, 256>}, {transform_indices = @transform_5, window_bounds = array<i64: 1, 256>}, {transform_indices = @transform_6, window_bounds = array<i64: 8, 256>}]} {
    %c0 = arith.constant 0 : index
    %c0_0 = arith.constant 0 : index
    %0 = vector.load %arg1[%c0, %c0_0] : memref<1x256xf32, #tpu.memory_space<vmem>>, vector<1x256xf32>
    %c0_1 = arith.constant 0 : index
    %c0_2 = arith.constant 0 : index
    %1 = vector.load %arg2[%c0_1, %c0_2] : memref<8x1xf32, #tpu.memory_space<vmem>>, vector<8x1xf32>
    %c0_3 = arith.constant 0 : index
    %c0_4 = arith.constant 0 : index
    %2 = vector.load %arg3[%c0_3, %c0_4] : memref<8x1xf32, #tpu.memory_space<vmem>>, vector<8x1xf32>
    %c0_5 = arith.constant 0 : index
    %c0_6 = arith.constant 0 : index
    %3 = vector.load %arg4[%c0_5, %c0_6] : memref<8x1xf32, #tpu.memory_space<vmem>>, vector<8x1xf32>
    %4 = vector.broadcast %0 : vector<1x256xf32> to vector<8x256xf32>
    %5 = vector.broadcast %3 : vector<8x1xf32> to vector<8x256xf32>
    %6 = arith.subf %4, %5 : vector<8x256xf32>
    %7 = vector.broadcast %2 : vector<8x1xf32> to vector<8x256xf32>
    %8 = arith.mulf %7, %6 : vector<8x256xf32>
    %9 = arith.mulf %8, %6 : vector<8x256xf32>
    %10 = vector.broadcast %1 : vector<8x1xf32> to vector<8x256xf32>
    %11 = arith.addf %10, %9 : vector<8x256xf32>
    %12 = math.exp %11 : vector<8x256xf32>
    %cst = arith.constant dense<0.000000e+00> : vector<256xf32>
    %13 = vector.multi_reduction <add>, %12, %cst [0] : vector<8x256xf32> to vector<256xf32>
    %14 = vector.shape_cast %13 : vector<256xf32> to vector<1x256xf32>
    %15 = math.log %14 : vector<1x256xf32>
    %c0_7 = arith.constant 0 : index
    %c0_8 = arith.constant 0 : index
    %16 = vector.load %arg6[%c0_7, %c0_8] : memref<1x256xf32, #tpu.memory_space<vmem>>, vector<1x256xf32>
    tpu.vector_store %arg6[%c0_7, %c0_8], %15 {strides = array<i32>} : memref<1x256xf32, #tpu.memory_space<vmem>>, vector<1x256xf32>,
    %cst_9 = arith.constant 9.99999935E-39 : f32
    %17 = vector.broadcast %cst_9 : f32 to vector<1x256xf32>
    %18 = arith.maximumf %14, %17 : vector<1x256xf32>
    %19 = tpu.reciprocal %18 : vector<1x256xf32> -> vector<1x256xf32>
    %20 = vector.broadcast %19 : vector<1x256xf32> to vector<8x256xf32>
    %21 = arith.mulf %12, %20 : vector<8x256xf32>
    %cst_10 = arith.constant 9.99999996E-13 : f32
    %cst_11 = arith.constant 1.000000e+00 : f32
    %22 = vector.broadcast %cst_10 : f32 to vector<8x256xf32>
    %23 = arith.maximumf %22, %21 : vector<8x256xf32>
    %24 = vector.broadcast %cst_11 : f32 to vector<8x256xf32>
    %25 = arith.minimumf %24, %23 : vector<8x256xf32>
    %c0_12 = arith.constant 0 : index
    %c0_13 = arith.constant 0 : index
    %26 = vector.load %arg5[%c0_12, %c0_13] : memref<8x256xf32, #tpu.memory_space<vmem>>, vector<8x256xf32>
    tpu.vector_store %arg5[%c0_12, %c0_13], %25 {strides = array<i32>} : memref<8x256xf32, #tpu.memory_space<vmem>>, vector<8x256xf32>,
    %27 = tpu.iota {dimensions = array<i32: 0>} : vector<8x256xi32>
    %cst_14 = arith.constant dense<0xFF800000> : vector<256xf32>
    %28 = vector.multi_reduction <maximumf>, %25, %cst_14 [0] : vector<8x256xf32> to vector<256xf32>
    %29 = vector.shape_cast %28 : vector<256xf32> to vector<1x256xf32>
    %30 = vector.broadcast %29 : vector<1x256xf32> to vector<8x256xf32>
    %31 = arith.cmpf oeq, %25, %30 : vector<8x256xf32>
    %c8_i32 = arith.constant 8 : i32
    %32 = vector.broadcast %c8_i32 : i32 to vector<8x256xi32>
    %33 = arith.select %31, %27, %32 : vector<8x256xi1>, vector<8x256xi32>
    %cst_15 = arith.constant dense<2147483647> : vector<256xi32>
    %34 = vector.multi_reduction <minsi>, %33, %cst_15 [0] : vector<8x256xi32> to vector<256xi32>
    %35 = vector.shape_cast %34 : vector<256xi32> to vector<1x256xi32>
    %36 = vector.broadcast %35 : vector<1x256xi32> to vector<8x256xi32>
    %37 = arith.cmpi eq, %27, %36 : vector<8x256xi32>
    %cst_16 = arith.constant 0xFF800000 : f32
    %38 = vector.broadcast %cst_16 : f32 to vector<8x256xf32>
    %39 = arith.select %37, %38, %25 : vector<8x256xi1>, vector<8x256xf32>
    %cst_17 = arith.constant dense<0xFF800000> : vector<256xf32>
    %40 = vector.multi_reduction <maximumf>, %39, %cst_17 [0] : vector<8x256xf32> to vector<256xf32>
    %41 = vector.shape_cast %40 : vector<256xf32> to vector<1x256xf32>
    %42 = vector.broadcast %41 : vector<1x256xf32> to vector<8x256xf32>
    %43 = arith.cmpf oeq, %39, %42 : vector<8x256xf32>
    %c8_i32_18 = arith.constant 8 : i32
    %44 = vector.broadcast %c8_i32_18 : i32 to vector<8x256xi32>
    %45 = arith.select %43, %27, %44 : vector<8x256xi1>, vector<8x256xi32>
    %cst_19 = arith.constant dense<2147483647> : vector<256xi32>
    %46 = vector.multi_reduction <minsi>, %45, %cst_19 [0] : vector<8x256xi32> to vector<256xi32>
    %47 = vector.shape_cast %46 : vector<256xi32> to vector<1x256xi32>
    %48 = vector.broadcast %35 : vector<1x256xi32> to vector<8x256xi32>
    %49 = arith.cmpi eq, %27, %48 : vector<8x256xi32>
    %50 = arith.extui %49 : vector<8x256xi1> to vector<8x256xi32>
    %51 = arith.sitofp %50 : vector<8x256xi32> to vector<8x256xf32>
    %52 = vector.broadcast %47 : vector<1x256xi32> to vector<8x256xi32>
    %53 = arith.cmpi eq, %27, %52 : vector<8x256xi32>
    %54 = arith.extui %53 : vector<8x256xi1> to vector<8x256xi32>
    %55 = arith.sitofp %54 : vector<8x256xi32> to vector<8x256xf32>
    %cst_20 = arith.constant 5.000000e-01 : f32
    %56 = vector.broadcast %cst_20 : f32 to vector<1x256xf32>
    %57 = arith.mulf %56, %29 : vector<1x256xf32>
    %58 = arith.cmpf ogt, %57, %41 : vector<1x256xf32>
    %cst_21 = arith.constant 2.000000e+00 : f32
    %59 = vector.broadcast %cst_21 : f32 to vector<8x256xf32>
    %60 = arith.mulf %59, %51 : vector<8x256xf32>
    %61 = arith.addf %51, %55 : vector<8x256xf32>
    %62 = vector.shape_cast %58 : vector<1x256xi1> to vector<1x256xi1>
    %63 = vector.broadcast %62 : vector<1x256xi1> to vector<8x256xi1>
    %64 = arith.select %63, %60, %61 : vector<8x256xi1>, vector<8x256xf32>
    %c0_22 = arith.constant 0 : index
    %c0_23 = arith.constant 0 : index
    %65 = vector.load %arg7[%c0_22, %c0_23] : memref<8x256xf32, #tpu.memory_space<vmem>>, vector<8x256xf32>
    tpu.vector_store %arg7[%c0_22, %c0_23], %64 {strides = array<i32>} : memref<8x256xf32, #tpu.memory_space<vmem>>, vector<8x256xf32>,
    return
  }
  func.func @transform_0(%arg0: i32) -> (i32, i32) {
    %c0_i32 = arith.constant 0 : i32
    %c0_i32_0 = arith.constant 0 : i32
    return %c0_i32, %arg0 : i32, i32
  }
  func.func @transform_1(%arg0: i32) -> (i32, i32) {
    %c0_i32 = arith.constant 0 : i32
    %c0_i32_0 = arith.constant 0 : i32
    %c0_i32_1 = arith.constant 0 : i32
    return %c0_i32, %c0_i32_0 : i32, i32
  }
  func.func @transform_2(%arg0: i32) -> (i32, i32) {
    %c0_i32 = arith.constant 0 : i32
    %c0_i32_0 = arith.constant 0 : i32
    %c0_i32_1 = arith.constant 0 : i32
    return %c0_i32, %c0_i32_0 : i32, i32
  }
  func.func @transform_3(%arg0: i32) -> (i32, i32) {
    %c0_i32 = arith.constant 0 : i32
    %c0_i32_0 = arith.constant 0 : i32
    %c0_i32_1 = arith.constant 0 : i32
    return %c0_i32, %c0_i32_0 : i32, i32
  }
  func.func @transform_4(%arg0: i32) -> (i32, i32) {
    %c0_i32 = arith.constant 0 : i32
    %c0_i32_0 = arith.constant 0 : i32
    return %c0_i32, %arg0 : i32, i32
  }
  func.func @transform_5(%arg0: i32) -> (i32, i32) {
    %c0_i32 = arith.constant 0 : i32
    %c0_i32_0 = arith.constant 0 : i32
    return %c0_i32, %arg0 : i32, i32
  }
  func.func @transform_6(%arg0: i32) -> (i32, i32) {
    %c0_i32 = arith.constant 0 : i32
    %c0_i32_0 = arith.constant 0 : i32
    return %c0_i32, %arg0 : i32, i32
  }
}

</mosaic_0001>

<bundles_post_ra>
// kernel: tpu_custom_call.1
= control target key start
LH: loop header
LB: loop body
LE: loop exit
PB: predicated region body
PF: predicated region fallthrough
CT: control target
= control target key end

     0   :  { %12 = vsyncpa [#allocation3], 0  ;;  %v350_v2 = vmov 0   ;;  %s489_s0 = inlined_call_operand.vmem [shape: f32[1,256], index: 0, kind: input, shape index: {}]   ;;  %s490_s1 = inlined_call_operand.vmem [shape: f32[8,1], index: 1, kind: input, shape index: {}]   ;;  %s491_s2 = inlined_call_operand.vmem [shape: f32[8,1], index: 2, kind: input, shape index: {}]   ;;  %s492_s3 = inlined_call_operand.vmem [shape: f32[8,1], index: 3, kind: input, shape index: {}]   ;;  %s493_s4 = inlined_call_operand.hbm [shape: f32[8,256], index: 4, kind: output, shape index: {0}]   ;;  %s494_s5 = inlined_call_operand.hbm [shape: f32[1,256], index: 5, kind: output, shape index: {1}]   ;;  %s495_s6 = inlined_call_operand.hbm [shape: f32[8,256], index: 6, kind: output, shape index: {2}]  }
   0x1   :  { %v25_v0 = vld [vmem:[%s492_s3] sm:$0xff]  ;;  %266 = vset.pattern.permute.xlu0 %v350_v2  ;;  %267 = vset.pattern.permute.xlu1 %v350_v2 }
   0x2   :  { %v23_v1 = vld [vmem:[%s490_s1] sm:$0xff] }
   0x3   :  { %13 = vsyncpa [#allocation5], 0  ;;  %39 = vperm.xlu0 %266, %v25_v0   ;;  %55 = vperm.xlu1 %267, %v23_v1   ;;  %v24_v3 = vld [vmem:[%s491_s2] sm:$0xff]  ;;  %v27_v4 = vlaneseq  ;;  %v351_v40 = vmov 1966171168   ;;  %s353_s27 = smov [#allocation2]  }
   0x4   :  { %v22_v8 = vld [vmem:[%s489_s0] sm:$0x3]  ;;  %v84_v41 = vunpack.c.l.s4 %v351_v40  ;;  %s352_s0 = smov [#allocation4]   ;;  %s221_s28 = sshll.u32 %s353_s27, 4  ;;  %s413_s28 = int_to_ptr.vmem [resolvable:$true] %s221_s28 }
   0x5   :  { %v400_v5 = vshrl.u32 %v27_v4, 7  ;;  %s231_s2 = sshll.u32 %s352_s0, 4  ;;  %vm100_vm0 = vcmp.lt.s32.totalorder %v27_v4, 256  ;;  %s232_s2 = int_to_ptr.vmem [resolvable:$true] %s231_s2 }
   0x6   :  { %v85_v42 = vunpack.c.0.s8 %v84_v41  ;;  %s280_s29 = scalar_lea.vmem %s232_s2, 32  ;;  %p285_p1 = scmp.lt.s32.totalorder %s232_s2, %s232_s2 }
   0x7   :  { %46 = vperm.xlu0 %266, %v24_v3   ;;  %v29_v6 = vsub.s32 0, %v400_v5  ;;  %v33_v7 = vsub.s32 1, %v400_v5  ;;  %p281_p0 = scmp.ne.s32.totalorder %s232_s2, %s280_s29  ;;  %p286_p2 = scmp.lt.s32.totalorder %s280_s29, %s280_s29 }
   0x8   :  { %v88_v48 = vsub.s32 %v85_v42, %v400_v5 }
   0x9   :  { %v30_v9 = vrot.slane %v22_v8, %v29_v6  ;;  %v34_v10 = vrot.slane %v22_v8, %v33_v7  ;;  %p287_p3 = por %p286_p2, %p285_p1 }
   0xb   :  { %p288_p4 = pnand %p287_p3, %p281_p0 }
  0x82   :  { %v40_v11 = vpop.permute.xlu0 %39  ;;  %v56_v17 = vpop.permute.xlu1 %55 }
  0x83   :  { %v42_v12 = vsub.f32 %v30_v9, %v40_v11  ;;  %v43_v13 = vsub.f32 %v34_v10, %v40_v11 }
  0x86   :  { %v47_v14 = vpop.permute.xlu0 %46 }
  0x87   :  { %v49_v15 = vmul.f32 %v47_v14, %v42_v12  ;;  %v50_v16 = vmul.f32 %v47_v14, %v43_v13 }
  0x89   :  { %v51_v18 = vmul.f32 %v49_v15, %v42_v12  ;;  %v52_v19 = vmul.f32 %v50_v16, %v43_v13 }
  0x8b   :  { %v58_v20 = vadd.f32 %v56_v17, %v51_v18  ;;  %v59_v21 = vadd.f32 %v56_v17, %v52_v19 }
  0x8d   :  { %v60_v22 = vmul.f32 1.442695, %v58_v20  ;;  %v62_v23 = vmul.f32 1.442695, %v59_v21 }
  0x8f   :  { %268 = vpow2.f32 %v60_v22 }
  0x90   :  { %270 = vpow2.f32 %v62_v23 }
  0x99   :  { %v269_v24 = vpop.eup %268 }
  0x9a   :  { %v271_v25 = vpop.eup %270  ;;  %v64_v26 = vrot.slane %v269_v24, 4 }
  0x9b   :  { %v70_v27 = vrot.slane %v271_v25, 4 }
  0x9c   :  { %v65_v28 = vadd.f32 %v269_v24, %v64_v26 }
  0x9d   :  { %v71_v29 = vadd.f32 %v271_v25, %v70_v27 }
  0x9e   :  { %v66_v30 = vrot.slane %v65_v28, 2 }
  0x9f   :  { %v72_v31 = vrot.slane %v71_v29, 2 }
  0xa0   :  { %v67_v32 = vadd.f32 %v66_v30, %v65_v28 }
  0xa1   :  { %v73_v33 = vadd.f32 %v72_v31, %v71_v29 }
  0xa2   :  { %v68_v34 = vrot.slane %v67_v32, 1 }
  0xa3   :  { %v74_v35 = vrot.slane %v73_v33, 1 }
  0xa4   :  { %v69_v36 = vadd.f32 %v68_v34, %v67_v32 }
  0xa5   :  { %v75_v37 = vadd.f32 %v74_v35, %v73_v33 }
  0xa6   :  { %272 = vlog2.f32 %v69_v36  ;;  %v103_v38 = vmax.f32 %v69_v36, 1e-38 }
  0xa7   :  { %274 = vlog2.f32 %v75_v37  ;;  %v104_v39 = vmax.f32 %v75_v37, 1e-38 }
  0xa8   :  { %276 = vrcp.f32 %v103_v38 }
  0xa9   :  { %278 = vrcp.f32 %v104_v39 }
  0xb0   :  { %v273_v43 = vpop.eup %272 }
  0xb1   :  { %v275_v44 = vpop.eup %274  ;;  %v77_v45 = vmul.f32 0.6931472, %v273_v43 }
  0xb2   :  { %v277_v46 = vpop.eup %276  ;;  %v79_v47 = vmul.f32 0.6931472, %v275_v44 }
  0xb3   :  { %v279_v49 = vpop.eup %278  ;;  %v107_v50 = vmul.f32 %v277_v46, %v269_v24 }
  0xb4   :  { %v82_v51 = vcombine.low %v77_v45, %v79_v47  ;;  %v108_v52 = vmul.f32 %v279_v49, %v271_v25 }
  0xb5   :  { %v109_v53 = vmax.f32 %v107_v50, 1e-12 }
  0xb6   :  { %v89_v54 = vrot.slane %v82_v51, %v88_v48  ;;  %v110_v55 = vmax.f32 %v108_v52, 1e-12 }
  0xb7   :  { %v408_v56 = vmin.f32 %v109_v53, 1.0 }
  0xb8   :  { %v96_v57 = vrot.slane %v89_v54, %v88_v48  ;;  %v410_v58 = vmin.f32 %v110_v55, 1.0 }
  0xb9   :  { %113 = vst [vmem:[#allocation2] sm:$0xff] %v408_v56  ;;  %v117_v59 = vrot.slane %v408_v56, 4 }
  0xba   :  { %102 = vst.msk [vmem:[#allocation4] sm:$0x3] %vm100_vm0, %v96_v57  ;;  %114 = vst [vmem:[#allocation2 + $0x8] sm:$0xff] %v410_v58  ;;  %v123_v60 = vrot.slane %v410_v58, 4 }
  0xbb   :  { %291 = shalt.err (!%p288_p4)
}
  0xbc   :  { %s292_s8 = scalar_lea.hbm %s494_s5, 32 }
  0xbd   :  { %p293_p5 = scmp.ne.s32.totalorder %s494_s5, %s292_s8  ;;  %p296_p6 = scmp.lt.u32.totalorder %s292_s8, %s494_s5 }
  0xbf   :  { %p298_p7 = pnand %p296_p6, %p293_p5 }
  0xc1   :  { %301 = shalt.err (!%p298_p7)
}
  0xc2   :  { %234 = dma.vmem_to_hbm [thread:$0]  %s232_s2, 32, %s494_s5, [#allocation5]   ;;  %v118_v61 = vmax.f32 %v408_v56, %v117_v59 }
  0xc3   :  { %s302_s15 = scalar_lea.vmem %s413_s28, 256  ;;  %p307_p9 = scmp.lt.s32.totalorder %s413_s28, %s413_s28 }
  0xc4   :  { %p303_p8 = scmp.ne.s32.totalorder %s413_s28, %s302_s15  ;;  %p308_p10 = scmp.lt.s32.totalorder %s302_s15, %s302_s15 }
  0xc6   :  { %p309_p11 = por %p308_p10, %p307_p9 }
  0xc8   :  { %p310_p12 = pnand %p309_p11, %p303_p8 }
  0xca   :  { %313 = shalt.err (!%p310_p12)
}
  0xcb   :  { %s314_s18 = scalar_lea.hbm %s493_s4, 256 }
  0xcc   :  { %p315_p13 = scmp.ne.s32.totalorder %s493_s4, %s314_s18  ;;  %p318_p0 = scmp.lt.u32.totalorder %s314_s18, %s493_s4 }
  0xce   :  { %p320_p1 = pnand %p318_p0, %p315_p13 }
  0xd0   :  { %323 = shalt.err (!%p320_p1)
}
  0xd1   :  { %224 = dma.vmem_to_hbm [thread:$0]  %s413_s28, 256, %s493_s4, [#allocation3]   ;;  %v124_v62 = vmax.f32 %v410_v58, %v123_v60  ;;  %v119_v63 = vrot.slane %v118_v61, 2  ;;  %v354_v49 = vmov 0.0  }
  0xd2   :  { %s355_s4 = smov [#allocation6]  }
  0xd3   :  { %v125_v0 = vrot.slane %v124_v62, 2  ;;  %v120_v1 = vmax.f32 %v118_v61, %v119_v63  ;;  %s241_s24 = sshll.u32 %s355_s4, 4  ;;  %s242_s24 = int_to_ptr.vmem [resolvable:$true] %s241_s24 }
  0xd4   :  { %s324_s25 = scalar_lea.vmem %s242_s24, 256  ;;  %p329_p3 = scmp.lt.s32.totalorder %s242_s24, %s242_s24 }
  0xd5   :  { %v126_v2 = vmax.f32 %v124_v62, %v125_v0  ;;  %v121_v3 = vrot.slane %v120_v1, 1  ;;  %p325_p2 = scmp.ne.s32.totalorder %s242_s24, %s324_s25  ;;  %p330_p4 = scmp.lt.s32.totalorder %s324_s25, %s324_s25 }
  0xd7   :  { %v127_v4 = vrot.slane %v126_v2, 1  ;;  %v449_v6 = vmax.f32 %v120_v1, %v121_v3  ;;  %p331_p5 = por %p330_p4, %p329_p3 }
  0xd9   :  { %v451_v7 = vmax.f32 %v126_v2, %v127_v4  ;;  %vm129_vm1 = vcmp.eq.f32.partialorder %v408_v56, %v449_v6  ;;  %v199_v54 = vmul.f32 0.5, %v449_v6  ;;  %p332_p6 = pnand %p331_p5, %p325_p2 }
  0xda   :  { %v131_v8 = vsel %vm129_vm1, %v400_v5, 8 }
  0xdb   :  { %vm130_vm2 = vcmp.eq.f32.partialorder %v410_v58, %v451_v7  ;;  %v133_v10 = vrot.slane %v131_v8, 4 }
  0xdc   :  { %v132_v9 = vsel %vm130_vm2, %v400_v5, 8 }
  0xdd   :  { %v142_v11 = vrot.slane %v132_v9, 4  ;;  %vm134_vm3 = vcmp.lt.s32.totalorder %v131_v8, %v133_v10 }
  0xde   :  { %v135_v12 = vsel %vm134_vm3, %v131_v8, %v133_v10 }
  0xdf   :  { %vm143_vm4 = vcmp.lt.s32.totalorder %v132_v9, %v142_v11  ;;  %v136_v13 = vrot.slane %v135_v12, 2 }
  0xe0   :  { %v144_v14 = vsel %vm143_vm4, %v132_v9, %v142_v11 }
  0xe1   :  { %v145_v15 = vrot.slane %v144_v14, 2  ;;  %vm137_vm5 = vcmp.lt.s32.totalorder %v135_v12, %v136_v13 }
  0xe2   :  { %v138_v16 = vsel %vm137_vm5, %v135_v12, %v136_v13 }
  0xe3   :  { %vm146_vm6 = vcmp.lt.s32.totalorder %v144_v14, %v145_v15  ;;  %v139_v17 = vrot.slane %v138_v16, 1 }
  0xe4   :  { %v147_v18 = vsel %vm146_vm6, %v144_v14, %v145_v15 }
  0xe5   :  { %v148_v19 = vrot.slane %v147_v18, 1  ;;  %vm140_vm7 = vcmp.lt.s32.totalorder %v138_v16, %v139_v17 }
  0xe6   :  { %v141_v20 = vsel %vm140_vm7, %v138_v16, %v139_v17 }
  0xe7   :  { %vm149_vm8 = vcmp.lt.s32.totalorder %v147_v18, %v148_v19  ;;  %vm151_vm9 = vcmp.eq.s32.totalorder %v400_v5, %v141_v20 }
  0xe8   :  { %v150_v21 = vsel %vm149_vm8, %v147_v18, %v148_v19  ;;  %v153_v22 = vsel %vm151_vm9, -inf, %v408_v56  ;;  %v256_v50 = vsel %vm151_vm9, 1.0, %v354_v49  ;;  %v200_v56 = vmul.f32 0.5, %v451_v7 }
  0xe9   :  { %vm152_vm10 = vcmp.eq.s32.totalorder %v400_v5, %v150_v21  ;;  %v155_v24 = vrot.slane %v153_v22, 4  ;;  %v203_v57 = vmul.f32 2.0, %v256_v50 }
  0xea   :  { %v154_v23 = vsel %vm152_vm10, -inf, %v410_v58  ;;  %v257_v52 = vsel %vm152_vm10, 1.0, %v354_v49 }
  0xeb   :  { %v161_v25 = vrot.slane %v154_v23, 4  ;;  %v156_v26 = vmax.f32 %v153_v22, %v155_v24  ;;  %v204_v59 = vmul.f32 2.0, %v257_v52 }
  0xed   :  { %v162_v27 = vmax.f32 %v154_v23, %v161_v25  ;;  %v157_v28 = vrot.slane %v156_v26, 2 }
  0xef   :  { %v163_v29 = vrot.slane %v162_v27, 2  ;;  %v158_v30 = vmax.f32 %v156_v26, %v157_v28 }
  0xf1   :  { %v164_v31 = vmax.f32 %v162_v27, %v163_v29  ;;  %v159_v32 = vrot.slane %v158_v30, 1 }
  0xf3   :  { %v165_v33 = vrot.slane %v164_v31, 1  ;;  %v160_v34 = vmax.f32 %v158_v30, %v159_v32 }
  0xf5   :  { %v166_v35 = vmax.f32 %v164_v31, %v165_v33  ;;  %vm167_vm11 = vcmp.eq.f32.partialorder %v153_v22, %v160_v34  ;;  %vm201_vm5 = vcmp.gt.f32.partialorder %v199_v54, %v160_v34 }
  0xf6   :  { %v169_v36 = vsel %vm167_vm11, %v400_v5, 8 }
  0xf7   :  { %vm168_vm12 = vcmp.eq.f32.partialorder %v154_v23, %v166_v35  ;;  %v171_v38 = vrot.slane %v169_v36, 4  ;;  %vm202_vm6 = vcmp.gt.f32.partialorder %v200_v56, %v166_v35 }
  0xf8   :  { %v170_v37 = vsel %vm168_vm12, %v400_v5, 8 }
  0xf9   :  { %v180_v39 = vrot.slane %v170_v37, 4  ;;  %vm172_vm13 = vcmp.lt.s32.totalorder %v169_v36, %v171_v38 }
  0xfa   :  { %v173_v40 = vsel %vm172_vm13, %v169_v36, %v171_v38 }
  0xfb   :  { %vm181_vm14 = vcmp.lt.s32.totalorder %v170_v37, %v180_v39  ;;  %v174_v41 = vrot.slane %v173_v40, 2 }
  0xfc   :  { %v182_v42 = vsel %vm181_vm14, %v170_v37, %v180_v39 }
  0xfd   :  { %v183_v43 = vrot.slane %v182_v42, 2  ;;  %vm175_vm15 = vcmp.lt.s32.totalorder %v173_v40, %v174_v41 }
  0xfe   :  { %v176_v44 = vsel %vm175_vm15, %v173_v40, %v174_v41 }
  0xff   :  { %vm184_vm0 = vcmp.lt.s32.totalorder %v182_v42, %v183_v43  ;;  %v177_v45 = vrot.slane %v176_v44, 1 }
 0x100   :  { %v185_v46 = vsel %vm184_vm0, %v182_v42, %v183_v43 }
 0x101   :  { %v186_v47 = vrot.slane %v185_v46, 1  ;;  %vm178_vm1 = vcmp.lt.s32.totalorder %v176_v44, %v177_v45 }
 0x102   :  { %v179_v48 = vsel %vm178_vm1, %v176_v44, %v177_v45 }
 0x103   :  { %vm187_vm2 = vcmp.lt.s32.totalorder %v185_v46, %v186_v47  ;;  %vm193_vm3 = vcmp.eq.s32.totalorder %v400_v5, %v179_v48 }
 0x104   :  { %v188_v51 = vsel %vm187_vm2, %v185_v46, %v186_v47  ;;  %v258_v53 = vsel %vm193_vm3, 1.0, %v354_v49 }
 0x105   :  { %vm194_vm4 = vcmp.eq.s32.totalorder %v400_v5, %v188_v51  ;;  %v205_v58 = vadd.f32 %v258_v53, %v256_v50 }
 0x106   :  { %v259_v55 = vsel %vm194_vm4, 1.0, %v354_v49 }
 0x107   :  { %v206_v60 = vadd.f32 %v259_v55, %v257_v52  ;;  %v211_v61 = vsel %vm201_vm5, %v203_v57, %v205_v58 }
 0x108   :  { %213 = vst [vmem:[#allocation6] sm:$0xff] %v211_v61 }
 0x109   :  { %v212_v62 = vsel %vm202_vm6, %v204_v59, %v206_v60 }
 0x10a   :  { %214 = vst [vmem:[#allocation6 + $0x8] sm:$0xff] %v212_v62 }
 0x10b   :  { %335 = shalt.err (!%p332_p6)
}
 0x10c   :  { %s336_s1 = scalar_lea.hbm %s495_s6, 256 }
 0x10d   :  { %p337_p7 = scmp.ne.s32.totalorder %s495_s6, %s336_s1  ;;  %p340_p8 = scmp.lt.u32.totalorder %s336_s1, %s495_s6 }
 0x10f   :  { %p342_p9 = pnand %p340_p8, %p337_p7 }
 0x111   :  { %345 = shalt.err (!%p342_p9)
}
 0x112   :  { %244 = dma.vmem_to_hbm [thread:$0]  %s242_s24, 256, %s495_s6, [#allocation5]  }
 0x113   :  { %346 = dma.done.wait [#allocation3], 256  }
 0x114   :  { %347 = vsyncadd [#allocation3], 4294967040 }
 0x115   :  { %348 = dma.done.wait [#allocation5], 288  }
 0x116   :  { %349 = vsyncadd [#allocation5], 4294967008 }
 0x117   :  { %254 = vsyncpa [#allocation3], 1 }
 0x118   :  { %255 = vsyncpa [#allocation5], 1 }

</bundles_post_ra>
